<compile_context>
chip_gen: v6e
topology: v6e:2x2x1
jax: 0.10.0
libtpu: 0.0.40
codegen_flags: <defaults>
</compile_context>

<pallas_src>
import functools

import jax
import jax.numpy as jnp
from jax import lax
from jax.experimental import pallas as pl
from jax.experimental.pallas import tpu as pltpu


def _round_up(x, m):
    return (x + m - 1) // m * m


def _vmem_capacity_bytes():
    """Physical per-core VMEM (generation aware), conservative fallback."""
    try:
        cap = int(pltpu.get_tpu_info().vmem_capacity_bytes)
        if cap > 0:
            return cap
    except Exception:
        pass
    return 64 * 1024 * 1024  # v7x-safe fallback; also valid on v5e/v6e


def classifier_kernel(x_ref, w1_ref, b1_ref, w2_ref, b2_ref,
                      feat_ref, out_ref, acc_ref, *, hw, ts, inv_hw, need_mask):
    """Grid = (batch tiles [parallel], spatial chunks [arbitrary])."""
    k = pl.program_id(1)

    @pl.when(k == 0)
    def _():
        acc_ref[...] = jnp.zeros_like(acc_ref)

    x = x_ref[...]                                           # (TN, C, TS) native dtype
    if need_mask:
        # Ragged spatial tail: zero lanes whose global index >= H*W (the
        # out-of-bounds part of a partial block is undefined data).
        lane = lax.broadcasted_iota(jnp.int32, x.shape, dimension=2)
        x = jnp.where(k * ts + lane < hw, x, jnp.zeros_like(x))
    # Cast fused into the reduction: no full f32 copy of the streamed block.
    acc_ref[...] += jnp.sum(x, axis=-1, dtype=jnp.float32)   # (TN, C)

    @pl.when(k == pl.num_programs(1) - 1)
    def _():
        pooled = acc_ref[...] * inv_hw                       # mean over H*W
        h = jnp.dot(pooled, w1_ref[...], preferred_element_type=jnp.float32)
        feat = jnp.maximum(h + b1_ref[...], 0.0)             # (TN, E_pad)
        feat_ref[...] = feat
        out_ref[...] = jnp.dot(feat, w2_ref[...],
                               preferred_element_type=jnp.float32) + b2_ref[...]


def prepare_params(w1, b1, w2, b2):
    """Pad fc weights to lane-dense shapes ONCE (hoisted out of the forward).

    w1: (C, E); b1: (E,); w2: (E, K); b2: (K,).  Weights keep their native
    dtype (pass bf16 weights to cut weight VMEM/DMA in half if acceptable).
    """
    C, E = w1.shape
    K = w2.shape[1]
    E_pad = _round_up(E, 128)
    K_pad = _round_up(K, 128)
    w1p = jnp.zeros((C, E_pad), w1.dtype).at[:, :E].set(w1)
    b1p = jnp.zeros((1, E_pad), jnp.float32).at[0, :E].set(b1.astype(jnp.float32))
    w2p = jnp.zeros((E_pad, K_pad), w2.dtype).at[:E, :K].set(w2)
    b2p = jnp.zeros((1, K_pad), jnp.float32).at[0, :K].set(b2.astype(jnp.float32))
    return dict(w1p=w1p, b1p=b1p, w2p=w2p, b2p=b2p, E=E, K=K)


def classifier_forward(x, params):
    """x: (N, C, H, W) any float dtype; params: from prepare_params."""
    N, C, H, W = x.shape
    HW = H * W
    w1p, b1p, w2p, b2p = params["w1p"], params["b1p"], params["w2p"], params["b2p"]
    E, K = params["E"], params["K"]
    E_pad, K_pad = w1p.shape[1], w2p.shape[1]
    itemsize = jnp.dtype(x.dtype).itemsize

    # ---------------- generation-aware VMEM / tile sizing -------------------
    cap = _vmem_capacity_bytes()
    safe_limit = int(cap * 0.75)          # ~48 MiB on v7x, ~96 MiB on v5e/v6e
    headroom = 2 * 1024 * 1024

    # Batch tile: multiple of 8; guarantee >=2 tiles when N >= 16 so the
    # "parallel" axis can be sharded across v7x's two TensorCores.
    TN = N if N < 16 else max(8, min(128, (N // 2) // 8 * 8))

    min_ts = HW if HW < 128 else 128

    # Actual resident-buffer sizes (weights are double-buffered by the pipeline).
    w_bytes = 2 * (w1p.size * w1p.dtype.itemsize + w2p.size * w2p.dtype.itemsize
                   + b1p.size * 4 + b2p.size * 4)
    out_bytes = 2 * TN * (E_pad + K_pad) * 4      # double-buffered f32 outputs
    acc_bytes = TN * C * 4

    # Per x-buffer budget (x is double-buffered); small cap on 64 MiB parts,
    # large cap on 128 MiB parts so TS (contiguous DMA run) can grow.
    per_buf_cap = (6 if cap <= 80 * 1024 * 1024 else 24) * 1024 * 1024
    x_budget = max(256 * 1024,
                   min(per_buf_cap,
                       (safe_limit - w_bytes - out_bytes - acc_bytes - headroom) // 2))

    # Shrink the batch tile if even the minimum spatial chunk would not fit.
    if N >= 8:
        max_tn = int((x_budget // max(1, C * min_ts * itemsize)) // 8 * 8)
        if max_tn >= 8:
            TN = min(TN, max_tn)

    # Spatial chunk: multiple of 128 (or the full extent); never exceeds HW,
    # so there is NO host-side padding of x.
    if HW < 128:
        TS = HW
    else:
        ts = (x_budget // max(1, TN * C * itemsize)) // 128 * 128
        TS = int(max(128, min(ts, (HW // 128) * 128)))

    x_bytes = 2 * TN * C * TS * itemsize
    total = x_bytes + w_bytes + out_bytes + acc_bytes + headroom
    vmem_limit = int(min(cap * 0.9, max(total, 32 * 1024 * 1024)))

    # ---------------- kernel launch (x streamed in its native dtype) --------
    x3 = x.reshape(N, C, HW)

    kernel = functools.partial(
        classifier_kernel, hw=HW, ts=TS, inv_hw=float(1.0 / HW),
        need_mask=(HW % TS != 0))

    feat_p, out_p = pl.pallas_call(
        kernel,
        out_shape=(
            jax.ShapeDtypeStruct((N, E_pad), jnp.float32),
            jax.ShapeDtypeStruct((N, K_pad), jnp.float32),
        ),
        grid_spec=pltpu.PrefetchScalarGridSpec(
            num_scalar_prefetch=0,
            grid=(pl.cdiv(N, TN), pl.cdiv(HW, TS)),
            in_specs=[
                pl.BlockSpec((TN, C, TS), lambda i, k: (i, 0, k)),   # streamed x
                pl.BlockSpec((C, E_pad), lambda i, k: (0, 0)),       # resident weights
                pl.BlockSpec((1, E_pad), lambda i, k: (0, 0)),
                pl.BlockSpec((E_pad, K_pad), lambda i, k: (0, 0)),
                pl.BlockSpec((1, K_pad), lambda i, k: (0, 0)),
            ],
            out_specs=(
                pl.BlockSpec((TN, E_pad), lambda i, k: (i, 0)),
                pl.BlockSpec((TN, K_pad), lambda i, k: (i, 0)),
            ),
            scratch_shapes=[pltpu.VMEM((TN, C), jnp.float32)],       # spatial-sum acc
        ),
        compiler_params=pltpu.CompilerParams(
            dimension_semantics=("parallel", "arbitrary"),
            vmem_limit_bytes=vmem_limit,
        ),
    )(x3, w1p, b1p, w2p, b2p)

    return feat_p[:, :E], out_p[:, :K]


def init_params(key, in_ch, num_classes, embeddingdim):
    """Deterministic init mimicking nn.Linear's uniform(-1/sqrt(fan_in), 1/sqrt(fan_in))."""
    k1, k2, k3, k4 = jax.random.split(key, 4)
    lim1 = 1.0 / jnp.sqrt(in_ch)
    lim2 = 1.0 / jnp.sqrt(embeddingdim)
    w1 = jax.random.uniform(k1, (in_ch, embeddingdim), jnp.float32, -lim1, lim1)
    b1 = jax.random.uniform(k2, (embeddingdim,), jnp.float32, -lim1, lim1)
    w2 = jax.random.uniform(k3, (embeddingdim, num_classes), jnp.float32, -lim2, lim2)
    b2 = jax.random.uniform(k4, (num_classes,), jnp.float32, -lim2, lim2)
    return w1, b1, w2, b2


if __name__ == "__main__":
    # Small shapes consistent with the module's forward.
    N, C, H, W = 2, 4, 16, 16
    num_classes, embeddingdim = 10, 32

    key = jax.random.PRNGKey(0)
    kx, kp = jax.random.split(key)
    x = jax.random.normal(kx, (N, C, H, W), jnp.float32)
    w1, b1, w2, b2 = init_params(kp, C, num_classes, embeddingdim)

    params = prepare_params(w1, b1, w2, b2)       # padded once, reused per call
    feat, out = classifier_forward(x, params)
    jax.block_until_ready((feat, out))

    # Pure-JAX reference check of the same semantics.
    pooled_ref = jnp.mean(x, axis=(2, 3))
    feat_ref = jnp.maximum(pooled_ref @ w1 + b1, 0.0)
    out_ref = feat_ref @ w2 + b2
    assert feat.shape == (N, embeddingdim) and out.shape == (N, num_classes)
    assert jnp.allclose(feat, feat_ref, atol=1e-5, rtol=1e-5)
    assert jnp.allclose(out, out_ref, atol=1e-5, rtol=1e-5)

    print("KERNEL_OK")
</pallas_src>

<mosaic_0001>
module attributes {stable_mosaic.version = 11 : i64} {
  func.func @classifier_kernel(%arg0: i32, %arg1: i32, %arg2: memref<2x4x256xf32, #tpu.memory_space<vmem>>, %arg3: memref<4x128xf32, #tpu.memory_space<vmem>>, %arg4: memref<1x128xf32, #tpu.memory_space<vmem>>, %arg5: memref<128x128xf32, #tpu.memory_space<vmem>>, %arg6: memref<1x128xf32, #tpu.memory_space<vmem>>, %arg7: memref<2x128xf32, #tpu.memory_space<vmem>>, %arg8: memref<2x128xf32, #tpu.memory_space<vmem>>, %arg9: memref<2x4xf32, #tpu.memory_space<vmem>>) attributes {dimension_semantics = [#tpu.dimension_semantics<parallel>, #tpu.dimension_semantics<arbitrary>], iteration_bounds = array<i64: 1, 1>, scalar_prefetch = 0 : i64, scratch_operands = 1 : i64, tpu.core_type = #tpu.core_type<tc>, window_params = [{transform_indices = @transform_0, window_bounds = array<i64: 2, 4, 256>}, {pipeline_mode = #tpu.pipeline_mode<synchronous>, transform_indices = @transform_1, window_bounds = array<i64: 4, 128>}, {pipeline_mode = #tpu.pipeline_mode<synchronous>, transform_indices = @transform_2, window_bounds = array<i64: 1, 128>}, {pipeline_mode = #tpu.pipeline_mode<synchronous>, transform_indices = @transform_3, window_bounds = array<i64: 128, 128>}, {pipeline_mode = #tpu.pipeline_mode<synchronous>, transform_indices = @transform_4, window_bounds = array<i64: 1, 128>}, {transform_indices = @transform_5, window_bounds = array<i64: 2, 128>}, {transform_indices = @transform_6, window_bounds = array<i64: 2, 128>}]} {
    %c0_i32 = arith.constant 0 : i32
    %0 = arith.cmpi eq, %arg1, %c0_i32 : i32
    %1 = arith.extui %0 : i1 to i32
    %c0_i32_0 = arith.constant 0 : i32
    %2 = arith.cmpi ne, %1, %c0_i32_0 : i32
    scf.if %2 {
      %cst_9 = arith.constant 0.000000e+00 : f32
      %11 = vector.broadcast %cst_9 : f32 to vector<2x4xf32>
      %c0_10 = arith.constant 0 : index
      %c0_11 = arith.constant 0 : index
      %12 = vector.load %arg9[%c0_10, %c0_11] : memref<2x4xf32, #tpu.memory_space<vmem>>, vector<2x4xf32>
      tpu.vector_store %arg9[%c0_10, %c0_11], %11 {strides = array<i32>} : memref<2x4xf32, #tpu.memory_space<vmem>>, vector<2x4xf32>,
    } else {
    }
    %c0 = arith.constant 0 : index
    %c0_1 = arith.constant 0 : index
    %c0_2 = arith.constant 0 : index
    %3 = vector.load %arg2[%c0, %c0_1, %c0_2] : memref<2x4x256xf32, #tpu.memory_space<vmem>>, vector<2x4x256xf32>
    %c0_3 = arith.constant 0 : index
    %c0_4 = arith.constant 0 : index
    %4 = vector.load %arg9[%c0_3, %c0_4] : memref<2x4xf32, #tpu.memory_space<vmem>>, vector<2x4xf32>
    %cst = arith.constant dense<0.000000e+00> : vector<2x4xf32>
    %5 = vector.multi_reduction <add>, %3, %cst [2] : vector<2x4x256xf32> to vector<2x4xf32>
    %6 = arith.addf %4, %5 : vector<2x4xf32>
    %c0_5 = arith.constant 0 : index
    %c0_6 = arith.constant 0 : index
    %7 = vector.load %arg9[%c0_5, %c0_6] : memref<2x4xf32, #tpu.memory_space<vmem>>, vector<2x4xf32>
    tpu.vector_store %arg9[%c0_5, %c0_6], %6 {strides = array<i32>} : memref<2x4xf32, #tpu.memory_space<vmem>>, vector<2x4xf32>,
    %c0_i32_7 = arith.constant 0 : i32
    %8 = arith.cmpi eq, %arg1, %c0_i32_7 : i32
    %9 = arith.extui %8 : i1 to i32
    %c0_i32_8 = arith.constant 0 : i32
    %10 = arith.cmpi ne, %9, %c0_i32_8 : i32
    scf.if %10 {
      %c0_9 = arith.constant 0 : index
      %c0_10 = arith.constant 0 : index
      %11 = vector.load %arg9[%c0_9, %c0_10] : memref<2x4xf32, #tpu.memory_space<vmem>>, vector<2x4xf32>
      %cst_11 = arith.constant 3.906250e-03 : f32
      %12 = vector.broadcast %cst_11 : f32 to vector<2x4xf32>
      %13 = arith.mulf %11, %12 : vector<2x4xf32>
      %c0_12 = arith.constant 0 : index
      %c0_13 = arith.constant 0 : index
      %14 = vector.load %arg3[%c0_12, %c0_13] : memref<4x128xf32, #tpu.memory_space<vmem>>, vector<4x128xf32>
      %cst_14 = arith.constant dense<0.000000e+00> : vector<2x128xf32>
      %15 = tpu.matmul %13, %14, %cst_14 {dimension_numbers = #tpu.dot_dimension_numbers<[1], [0], [0], [1], [0, 0, 1, 1], [], []>} : vector<2x4xf32>, vector<4x128xf32>, vector<2x128xf32> -> vector<2x128xf32>
      %c0_15 = arith.constant 0 : index
      %c0_16 = arith.constant 0 : index
      %16 = vector.load %arg4[%c0_15, %c0_16] : memref<1x128xf32, #tpu.memory_space<vmem>>, vector<1x128xf32>
      %17 = vector.broadcast %16 : vector<1x128xf32> to vector<2x128xf32>
      %18 = arith.addf %15, %17 : vector<2x128xf32>
      %cst_17 = arith.constant 0.000000e+00 : f32
      %19 = vector.broadcast %cst_17 : f32 to vector<2x128xf32>
      %20 = arith.maximumf %18, %19 : vector<2x128xf32>
      %c0_18 = arith.constant 0 : index
      %c0_19 = arith.constant 0 : index
      %21 = vector.load %arg7[%c0_18, %c0_19] : memref<2x128xf32, #tpu.memory_space<vmem>>, vector<2x128xf32>
      tpu.vector_store %arg7[%c0_18, %c0_19], %20 {strides = array<i32>} : memref<2x128xf32, #tpu.memory_space<vmem>>, vector<2x128xf32>,
      %c0_20 = arith.constant 0 : index
      %c0_21 = arith.constant 0 : index
      %22 = vector.load %arg5[%c0_20, %c0_21] : memref<128x128xf32, #tpu.memory_space<vmem>>, vector<128x128xf32>
      %cst_22 = arith.constant dense<0.000000e+00> : vector<2x128xf32>
      %23 = tpu.matmul %20, %22, %cst_22 {dimension_numbers = #tpu.dot_dimension_numbers<[1], [0], [0], [1], [0, 0, 1, 1], [], []>} : vector<2x128xf32>, vector<128x128xf32>, vector<2x128xf32> -> vector<2x128xf32>
      %c0_23 = arith.constant 0 : index
      %c0_24 = arith.constant 0 : index
      %24 = vector.load %arg6[%c0_23, %c0_24] : memref<1x128xf32, #tpu.memory_space<vmem>>, vector<1x128xf32>
      %25 = vector.broadcast %24 : vector<1x128xf32> to vector<2x128xf32>
      %26 = arith.addf %23, %25 : vector<2x128xf32>
      %c0_25 = arith.constant 0 : index
      %c0_26 = arith.constant 0 : index
      %27 = vector.load %arg8[%c0_25, %c0_26] : memref<2x128xf32, #tpu.memory_space<vmem>>, vector<2x128xf32>
      tpu.vector_store %arg8[%c0_25, %c0_26], %26 {strides = array<i32>} : memref<2x128xf32, #tpu.memory_space<vmem>>, vector<2x128xf32>,
    } else {
    }
    return
  }
  func.func @transform_0(%arg0: i32, %arg1: i32) -> (i32, i32, i32) {
    %c0_i32 = arith.constant 0 : i32
    %c0_i32_0 = arith.constant 0 : i32
    return %arg0, %c0_i32, %arg1 : i32, i32, i32
  }
  func.func @transform_1(%arg0: i32, %arg1: i32) -> (i32, i32) {
    %c0_i32 = arith.constant 0 : i32
    %c0_i32_0 = arith.constant 0 : i32
    %c0_i32_1 = arith.constant 0 : i32
    return %c0_i32, %c0_i32_0 : i32, i32
  }
  func.func @transform_2(%arg0: i32, %arg1: i32) -> (i32, i32) {
    %c0_i32 = arith.constant 0 : i32
    %c0_i32_0 = arith.constant 0 : i32
    %c0_i32_1 = arith.constant 0 : i32
    return %c0_i32, %c0_i32_0 : i32, i32
  }
  func.func @transform_3(%arg0: i32, %arg1: i32) -> (i32, i32) {
    %c0_i32 = arith.constant 0 : i32
    %c0_i32_0 = arith.constant 0 : i32
    %c0_i32_1 = arith.constant 0 : i32
    return %c0_i32, %c0_i32_0 : i32, i32
  }
  func.func @transform_4(%arg0: i32, %arg1: i32) -> (i32, i32) {
    %c0_i32 = arith.constant 0 : i32
    %c0_i32_0 = arith.constant 0 : i32
    %c0_i32_1 = arith.constant 0 : i32
    return %c0_i32, %c0_i32_0 : i32, i32
  }
  func.func @transform_5(%arg0: i32, %arg1: i32) -> (i32, i32) {
    %c0_i32 = arith.constant 0 : i32
    %c0_i32_0 = arith.constant 0 : i32
    return %arg0, %c0_i32 : i32, i32
  }
  func.func @transform_6(%arg0: i32, %arg1: i32) -> (i32, i32) {
    %c0_i32 = arith.constant 0 : i32
    %c0_i32_0 = arith.constant 0 : i32
    return %arg0, %c0_i32 : i32, i32
  }
}

</mosaic_0001>

<bundles_post_ra>
// kernel: tpu_custom_call.1
= control target key start
LH: loop header
LB: loop body
LE: loop exit
PB: predicated region body
PF: predicated region fallthrough
CT: control target
= control target key end

     0   :  { %12 = vsyncpa [#allocation4], 0  ;;  %s597_s0 = inlined_call_operand.hbm [shape: f32[2,4,256], index: 0, kind: input, shape index: {}]   ;;  %s598_s1 = inlined_call_operand.hbm [shape: f32[4,128], index: 1, kind: input, shape index: {}]   ;;  %s599_s2 = inlined_call_operand.vmem [shape: f32[1,128], index: 2, kind: input, shape index: {}]   ;;  %s600_s3 = inlined_call_operand.hbm [shape: f32[128,128], index: 3, kind: input, shape index: {}]   ;;  %s601_s4 = inlined_call_operand.vmem [shape: f32[1,128], index: 4, kind: input, shape index: {}]   ;;  %s602_s5 = inlined_call_operand.hbm [shape: f32[2,128], index: 5, kind: output, shape index: {0}]   ;;  %s603_s6 = inlined_call_operand.hbm [shape: f32[2,128], index: 6, kind: output, shape index: {1}]  }
   0x1   :  { %13 = vsyncpa [#allocation7], 0 }
   0x2   :  { %14 = vsyncpa [#allocation5], 0 }
   0x3   :  { %15 = vsyncpa [#allocation11], 0  ;;  %s505_s21 = smov [#allocation6]   ;;  %s506_s23 = smov [#allocation3]  }
   0x4   :  { %s34_s22 = sshll.u32 %s505_s21, 4  ;;  %s21_s24 = sshll.u32 %s506_s23, 4  ;;  %s35_s22 = int_to_ptr.vmem [resolvable:$true] %s34_s22  ;;  %s22_s24 = int_to_ptr.vmem [resolvable:$true] %s21_s24 }
   0x5   :  { %s405_s25 = scalar_lea.vmem %s35_s22, 64  ;;  %p410_p1 = scmp.lt.s32.totalorder %s35_s22, %s35_s22 }
   0x6   :  { %p406_p0 = scmp.ne.s32.totalorder %s35_s22, %s405_s25  ;;  %p411_p2 = scmp.lt.s32.totalorder %s405_s25, %s405_s25 }
   0x8   :  { %p412_p3 = por %p411_p2, %p410_p1 }
   0xa   :  { %p413_p4 = pnand %p412_p3, %p406_p0 }
   0xc   :  { %416 = shalt.err (!%p413_p4)
}
   0xd   :  { %37 = dma.hbm_to_vmem [thread:$0]  %s598_s1, 64, %s35_s22, [#allocation7]  }
   0xe   :  { %s425_s28 = scalar_lea.vmem %s22_s24, 256  ;;  %p430_p6 = scmp.lt.s32.totalorder %s22_s24, %s22_s24 }
   0xf   :  { %p426_p5 = scmp.ne.s32.totalorder %s22_s24, %s425_s28  ;;  %p431_p7 = scmp.lt.s32.totalorder %s425_s28, %s425_s28 }
  0x11   :  { %p432_p8 = por %p431_p7, %p430_p6 }
  0x13   :  { %p433_p9 = pnand %p432_p8, %p426_p5 }
  0x15   :  { %436 = shalt.err (!%p433_p9)
}
  0x16   :  { %s507_s29 = smov 128   ;;  %s508_s30 = smov 8  }
  0x17   :  { %27 = dma.hbm_to_vmem [thread:$0]  %s597_s0, 256, %s22_s24, [#allocation4], %s507_s29, %s507_s29, %s508_s30  }
  0x18   :  { %s509_s9 = smov [#allocation8]  }
  0x19   :  { %s45_s10 = sshll.u32 %s509_s9, 4  ;;  %s46_s10 = int_to_ptr.vmem [resolvable:$true] %s45_s10 }
  0x1a   :  { %s445_s11 = scalar_lea.vmem %s46_s10, 2048  ;;  %p450_p11 = scmp.lt.s32.totalorder %s46_s10, %s46_s10 }
  0x1b   :  { %p446_p10 = scmp.ne.s32.totalorder %s46_s10, %s445_s11  ;;  %p451_p12 = scmp.lt.s32.totalorder %s445_s11, %s445_s11 }
  0x1d   :  { %p452_p13 = por %p451_p12, %p450_p11 }
  0x1f   :  { %p453_p0 = pnand %p452_p13, %p446_p10 }
  0x21   :  { %456 = shalt.err (!%p453_p0)
}
  0x22   :  { %51 = dma.hbm_to_vmem [thread:$0]  %s600_s3, 2048, %s46_s10, [#allocation7], %s507_s29, %s507_s29, %s508_s30  }
  0x23   :  { %497 = dma.done.wait [#allocation4], 256  }
  0x24   :  { %498 = vsyncadd [#allocation4], 4294967040 }
  0x25   :  { %499 = dma.done.wait [#allocation7], 2112  }
  0x26   :  { %500 = vsyncadd [#allocation7], 4294965184  ;;  %vm78_vm0 = vcmask 1043456   ;;  %v69_v0 = vld [vmem:[#allocation3] sm:$0xff]  ;;  %v70_v1 = vld [vmem:[#allocation3 + $0x8] sm:$0xff]  ;;  %vm67_vm1 = vcmask 25600   ;;  %v91_v25 = vlaneseq }
  0x27   :  { %v74_v2 = vcombine.high %v69_v0, %v69_v0  ;;  %v79_v3 = vsel %vm78_vm0, %v69_v0, 0.0  ;;  %v75_v4 = vcombine.high %v70_v1, %v70_v1  ;;  %v84_v6 = vsel %vm78_vm0, %v70_v1, 0.0  ;;  %v112_v11 = vld [vmem:[#allocation6] sm:$0xf]  ;;  %v213_v13 = vld [vmem:[#allocation8 + $0x70] sm:$0xff]  ;;  %v212_v14 = vld [vmem:[#allocation8 + $0x68] sm:$0xff] }
  0x28   :  { %v510_v10 = vmov 0.0   ;;  %vm511_vm2 = vmmov 0   ;;  %v214_v12 = vld [vmem:[#allocation8 + $0x78] sm:$0xff]  ;;  %v211_v15 = vld [vmem:[#allocation8 + $0x60] sm:$0xff]  ;;  %v209_v17 = vld [vmem:[#allocation8 + $0x50] sm:$0xff]  ;;  %v92_v26 = vand.u32 127, %v91_v25 }
  0x29   :  { %v80_v5 = vsel %vm78_vm0, %v74_v2, 0.0  ;;  %v85_v7 = vsel %vm78_vm0, %v75_v4, 0.0  ;;  %68 = vst.msk [vmem:[#allocation2] sm:$0x3] %vm67_vm1, %v510_v10  ;;  %346 = vmatprep.subr.mxu0 %v510_v10  ;;  %351 = vmatprep.subr.mxu1 %v510_v10  ;;  %v210_v16 = vld [vmem:[#allocation8 + $0x58] sm:$0xff]  ;;  %v208_v18 = vld [vmem:[#allocation8 + $0x48] sm:$0xff] }
  0x2a   :  { %v81_v8 = vadd.f32 %v80_v5, %v79_v3  ;;  %v86_v9 = vadd.f32 %v85_v7, %v84_v6  ;;  %347 = vmatpush3.msk.msra.mxu0 %vm78_vm0, %v112_v11  ;;  %348 = vmatprep.mubr.msk.f32.mxu0 %vm511_vm2, %v510_v10  ;;  %v207_v19 = vld [vmem:[#allocation8 + $0x40] sm:$0xff]  ;;  %v206_v20 = vld [vmem:[#allocation8 + $0x38] sm:$0xff]  ;;  %v205_v21 = vld [vmem:[#allocation8 + $0x30] sm:$0xff]  ;;  %v94_v27 = vshrl.u32 %v91_v25, 7  ;;  %vm101_vm3 = vcmask 1041409   ;;  %s512_s13 = smov [#allocation9]  }
  0x2b   :  { %383 = vmatprep.mubr.msk.f32.mxu1 %vm511_vm2, %v510_v10  ;;  %352 = vmatpush3.msra.mxu1 %v214_v12  ;;  %v204_v22 = vld [vmem:[#allocation8 + $0x28] sm:$0xff]  ;;  %v203_v23 = vld [vmem:[#allocation8 + $0x20] sm:$0xff]  ;;  %v202_v24 = vld [vmem:[#allocation8 + $0x18] sm:$0xff]  ;;  %vm120_vm4 = vcmask 31744   ;;  %s299_s14 = sshll.u32 %s512_s13, 4  ;;  %s300_s14 = int_to_ptr.vmem [resolvable:$true] %s299_s14 }
  0x2c   :  { %82 = vadd.xlane.f32.xlu0 %v81_v8  ;;  %353 = vmatprep.subr.mxu1 %v510_v10  ;;  %v95_v29 = vsub.s32 %v92_v26, %v94_v27  ;;  %v201_v38 = vld [vmem:[#allocation8 + $0x10] sm:$0xff]  ;;  %v200_v39 = vld [vmem:[#allocation8 + $0x8] sm:$0xff]  ;;  %v199_v40 = vld [vmem:[#allocation8] sm:$0xff]  ;;  %s457_s15 = scalar_lea.vmem %s300_s14, 32  ;;  %p462_p2 = scmp.lt.s32.totalorder %s300_s14, %s300_s14 }
  0x2d   :  { %354 = vmatpush3.msra.mxu1 %v213_v13  ;;  %v323_v41 = vld [vmem:[%s599_s2] ss:$0 sm:$0xff]  ;;  %p458_p1 = scmp.ne.s32.totalorder %s300_s14, %s457_s15  ;;  %p463_p3 = scmp.lt.s32.totalorder %s457_s15, %s457_s15 }
  0x2e   :  { %355 = vmatprep.subr.mxu1 %v510_v10 }
  0x2f   :  { %356 = vmatpush3.msra.mxu1 %v212_v14  ;;  %p464_p4 = por %p463_p3, %p462_p2 }
  0x30   :  { %87 = vadd.xlane.f32.xlu0 %v86_v9  ;;  %357 = vmatprep.subr.mxu1 %v510_v10  ;;  %v71_v32 = vld [vmem:[#allocation2] sm:$0x3] }
  0x31   :  { %358 = vmatpush3.msra.mxu1 %v211_v15  ;;  %p465_p5 = pnand %p464_p4, %p458_p1 }
  0x32   :  { %359 = vmatprep.subr.mxu1 %v510_v10 }
  0x33   :  { %360 = vmatpush3.msra.mxu1 %v210_v16 }
  0x34   :  { %361 = vmatprep.subr.mxu1 %v510_v10 }
  0x35   :  { %362 = vmatpush3.msra.mxu1 %v209_v17 }
  0x36   :  { %363 = vmatprep.subr.mxu1 %v510_v10 }
  0x37   :  { %364 = vmatpush3.msra.mxu1 %v208_v18 }
  0x38   :  { %365 = vmatprep.subr.mxu1 %v510_v10 }
  0x39   :  { %366 = vmatpush3.msra.mxu1 %v207_v19 }
  0x3a   :  { %367 = vmatprep.subr.mxu1 %v510_v10 }
  0x3b   :  { %368 = vmatpush3.msra.mxu1 %v206_v20 }
  0x3c   :  { %369 = vmatprep.subr.mxu1 %v510_v10 }
  0x3d   :  { %370 = vmatpush3.msra.mxu1 %v205_v21 }
  0x3e   :  { %371 = vmatprep.subr.mxu1 %v510_v10 }
  0x3f   :  { %372 = vmatpush3.msra.mxu1 %v204_v22 }
  0x40   :  { %373 = vmatprep.subr.mxu1 %v510_v10 }
  0x41   :  { %374 = vmatpush3.msra.mxu1 %v203_v23 }
  0x42   :  { %375 = vmatprep.subr.mxu1 %v510_v10 }
  0x43   :  { %376 = vmatpush3.msra.mxu1 %v202_v24 }
  0x44   :  { %377 = vmatprep.subr.mxu1 %v510_v10 }
  0x45   :  { %378 = vmatpush3.msra.mxu1 %v201_v38 }
  0x46   :  { %379 = vmatprep.subr.mxu1 %v510_v10 }
  0x47   :  { %380 = vmatpush3.msra.mxu1 %v200_v39 }
  0x48   :  { %381 = vmatprep.subr.mxu1 %v510_v10 }
  0x49   :  { %382 = vmatpush3.msra.mxu1 %v199_v40 }
  0xb5   :  { %v83_v28 = vpop.xlane.xlu0 %82 }
  0xb6   :  { %v96_v31 = vrot.slane %v83_v28, %v95_v29 }
  0xb9   :  { %v88_v30 = vpop.xlane.xlu0 %87 }
  0xba   :  { %v100_v33 = vrot.slane %v88_v30, %v95_v29 }
  0xbc   :  { %v102_v34 = vsel %vm101_vm3, %v100_v33, %v96_v31 }
  0xbd   :  { %v104_v35 = vadd.f32 %v102_v34, %v71_v32 }
  0xbf   :  { %106 = vst.msk [vmem:[#allocation2] sm:$0x3] %vm67_vm1, %v104_v35 }
  0xc6   :  { %v110_v36 = vld [vmem:[#allocation2] sm:$0x3] }
  0xc7   :  { %v111_v37 = vmul.f32 0.00390625, %v110_v36 }
  0xc9   :  { %349 = vmatmul.mubr.msk.f32.vlgmr.msra.gmra.mxu0 %vm120_vm4, %v111_v37 }
 0x189   :  { %v193_v42 = vpop.f32.mrf.mxu0 }
 0x18a   :  { %v194_v43 = vadd.f32 %v323_v41, %v193_v42 }
 0x18b   :  { %v350_v44 = vpop.f32.mrf.mxu0 }
 0x18c   :  { %v197_v45 = vmax.f32 %v194_v43, 0.0 }
 0x18e   :  { %198 = vst [vmem:[#allocation9] sm:$0x3] %v197_v45  ;;  %384 = vmatmul.mubr.f32.vlgmr.msra.gmra.mxu1 %v197_v45 }
 0x18f   :  { %468 = shalt.err (!%p465_p5)
}
 0x190   :  { %302 = dma.vmem_to_hbm [thread:$0]  %s300_s14, 32, %s602_s5, [#allocation5]   ;;  %v326_v46 = vld [vmem:[%s601_s4] ss:$0 sm:$0xff] }
 0x191   :  { %s513_s19 = smov [#allocation10]  }
 0x192   :  { %s309_s20 = sshll.u32 %s513_s19, 4  ;;  %s310_s20 = int_to_ptr.vmem [resolvable:$true] %s309_s20 }
 0x193   :  { %s477_s21 = scalar_lea.vmem %s310_s20, 32  ;;  %p482_p7 = scmp.lt.s32.totalorder %s310_s20, %s310_s20 }
 0x194   :  { %p478_p6 = scmp.ne.s32.totalorder %s310_s20, %s477_s21  ;;  %p483_p8 = scmp.lt.s32.totalorder %s477_s21, %s477_s21 }
 0x196   :  { %p484_p9 = por %p483_p8, %p482_p7 }
 0x198   :  { %p485_p10 = pnand %p484_p9, %p478_p6 }
 0x24e   :  { %v288_v47 = vpop.f32.mrf.mxu1 }
 0x24f   :  { %v289_v48 = vadd.f32 %v326_v46, %v288_v47 }
 0x250   :  { %v385_v49 = vpop.f32.mrf.mxu1 }
 0x251   :  { %292 = vst [vmem:[#allocation10] sm:$0x3] %v289_v48 }
 0x252   :  { %488 = shalt.err (!%p485_p10)
}
 0x253   :  { %312 = dma.vmem_to_hbm [thread:$0]  %s310_s20, 32, %s603_s6, [#allocation11]  }
 0x254   :  { %501 = dma.done.wait [#allocation5], 32  }
 0x255   :  { %502 = vsyncadd [#allocation5], 4294967264 }
 0x256   :  { %503 = dma.done.wait [#allocation11], 32  }
 0x257   :  { %504 = vsyncadd [#allocation11], 4294967264 }
 0x258   :  { %319 = vsyncpa [#allocation4], 1 }
 0x259   :  { %320 = vsyncpa [#allocation7], 1 }
 0x25a   :  { %321 = vsyncpa [#allocation5], 1 }
 0x25b   :  { %322 = vsyncpa [#allocation11], 1 }

</bundles_post_ra>
